<compile_context>
chip_gen: v5e
topology: v5e:2x2
jax: 0.10.0
libtpu: 0.0.40
codegen_flags: <defaults>
</compile_context>

<pallas_src>
import numpy as np

import jax
import jax.numpy as jnp
from jax.experimental import pallas as pl
from jax.experimental.pallas import tpu as pltpu

# ---- small, deterministic config (implied by the module) --------------------
B = 2            # batch
R = 16           # memory.num_rows
C = 16           # memory.num_cols
H = 32           # hidden_size
MS = 1           # max_shift
S = 2 * MS + 1   # shift-kernel width
T = C + 1 + 1 + S + 1   # fc output size (unpacking scheme total) = 22
F = H + C               # fc input size

# One-hot circular-shift matrices: (w @ P[i])[b, j] == w[b, (j + i - MS) mod R]
_P_NP = np.zeros((S, R, R), dtype=np.float32)
for _i in range(S):
    for _j in range(R):
        _P_NP[_i, (_j + _i - MS) % R, _j] = 1.0


def read_head_kernel(h_ref, prev_w_ref, mem_ref, wk_ref, wctl_ref, shift_ref,
                     out_ref):
    h = h_ref[...]            # (B, F+1)   hidden state with ones column (bias)
    prev_w = prev_w_ref[...]  # (B, R)
    mem = mem_ref[...]        # (B, R, C)

    # ---- fc (bias folded into weights), split key / control ----------------
    k = jnp.tanh(jnp.dot(h, wk_ref[...],
                         preferred_element_type=jnp.float32))        # (B, C)
    z_ctl = jnp.dot(h, wctl_ref[...],
                    preferred_element_type=jnp.float32)               # (B, 6)

    beta = jax.nn.softplus(z_ctl[:, 0:1])                             # (B, 1)
    g = jax.nn.sigmoid(z_ctl[:, 1:2])                                 # (B, 1)
    s = jax.nn.softmax(z_ctl[:, 2:2 + S], axis=1)                     # (B, S)
    gamma = 1.0 + jax.nn.softplus(z_ctl[:, 2 + S:3 + S])              # (B, 1)

    # ---- content addressing: cosine similarity + softmax (MXU dot) ---------
    dot = jnp.einsum('bqc,brc->bqr', k.reshape(B, 1, C), mem,
                     preferred_element_type=jnp.float32).reshape(B, R)
    k2 = jnp.sum(k * k, axis=1, keepdims=True)                        # (B, 1)
    m2 = jnp.sum(mem * mem, axis=2)                                   # (B, R)
    # max(|k||m|, 1e-8) == sqrt(max(k2*m2, 1e-16)); rsqrt runs on the EUP.
    sim = dot * jax.lax.rsqrt(jnp.maximum(k2 * m2, 1e-16))
    w_c = jax.nn.softmax(beta * sim, axis=1)                          # (B, R)

    # ---- gated interpolation ------------------------------------------------
    w_g = g * w_c + (1.0 - g) * prev_w                                # (B, R)

    # ---- modified circular shift via one-hot shift matrices on the MXU ------
    w_s = jnp.zeros_like(w_g)
    for i in range(S):  # S=3, static unroll
        rolled = jnp.dot(w_g, shift_ref[i],
                         preferred_element_type=jnp.float32)          # (B, R)
        w_s = w_s + s[:, i:i + 1] * rolled

    # ---- sharpening ----------------------------------------------------------
    w_pow = jnp.power(jnp.maximum(w_s, 1e-30), gamma)   # floor guards log(0)
    w = w_pow / (jnp.sum(w_pow, axis=1, keepdims=True) + 1e-16)

    # ---- read: (B,1,R) @ (B,R,C) -> (B,C) on the MXU -------------------------
    read = jnp.einsum('bqr,brc->bqc', w.reshape(B, 1, R), mem,
                      preferred_element_type=jnp.float32).reshape(B, C)

    # Single fused, lane-contiguous store: [read | w] -> (B, C+R)
    out_ref[...] = jnp.concatenate([read, w], axis=1).astype(out_ref.dtype)


@jax.jit
def read_head_forward(h, prev_w, mem, wfc, bfc):
    # Layout plumbing (recommended by review): fold bias into the weight via a
    # ones column on h, split the fc weight into key / control parts.
    h_aug = jnp.concatenate([h, jnp.ones((h.shape[0], 1), h.dtype)], axis=1)
    wfc_aug = jnp.concatenate([wfc, bfc], axis=0)       # (F+1, T)
    wk = wfc_aug[:, :C]                                 # (F+1, C)
    wctl = wfc_aug[:, C:]                               # (F+1, 6)
    shift_mats = jnp.asarray(_P_NP)                     # (S, R, R) constant

    vmem = pltpu.MemorySpace.VMEM
    out = pl.pallas_call(
        read_head_kernel,
        out_shape=jax.ShapeDtypeStruct((B, C + R), jnp.float32),
        in_specs=[
            pl.BlockSpec(memory_space=vmem),   # h_aug
            pl.BlockSpec(memory_space=vmem),   # prev_w
            pl.BlockSpec(memory_space=vmem),   # mem
            pl.BlockSpec(memory_space=vmem),   # wk
            pl.BlockSpec(memory_space=vmem),   # wctl
            pl.BlockSpec(memory_space=vmem),   # shift matrices
        ],
        out_specs=pl.BlockSpec(memory_space=vmem),
    )(h_aug, prev_w, mem, wk, wctl, shift_mats)

    return out[:, :C], out[:, C:]


def reference(h, prev_w, mem, wfc, bfc):
    """Plain-JAX reference of the same forward pass (for sanity check)."""
    z = h @ wfc + bfc
    k = jnp.tanh(z[:, :C])
    beta = jax.nn.softplus(z[:, C:C + 1])
    g = jax.nn.sigmoid(z[:, C + 1:C + 2])
    s = jax.nn.softmax(z[:, C + 2:C + 2 + S], axis=1)
    gamma = 1.0 + jax.nn.softplus(z[:, C + 2 + S:C + 3 + S])

    dot = jnp.einsum("bc,brc->br", k, mem)
    sim = dot / jnp.maximum(
        jnp.linalg.norm(k, axis=1, keepdims=True) * jnp.linalg.norm(mem, axis=2), 1e-8)
    w_c = jax.nn.softmax(beta * sim, axis=1)
    w_g = g * w_c + (1.0 - g) * prev_w

    unrolled = jnp.concatenate([w_g[:, R - MS:], w_g, w_g[:, :MS]], axis=1)
    w_s = sum(unrolled[:, i:i + R] * s[:, i:i + 1] for i in range(S))

    w_pow = jnp.power(w_s, gamma)
    w = w_pow / (jnp.sum(w_pow, axis=1, keepdims=True) + 1e-16)
    read = jnp.einsum("br,brc->bc", w, mem)
    return read, w


if __name__ == "__main__":
    key = jax.random.PRNGKey(0)
    k1, k2, k3, k4 = jax.random.split(key, 4)

    h = jax.random.normal(k1, (B, F), jnp.float32)
    mem = jax.random.normal(k2, (B, R, C), jnp.float32)
    # deterministic synthetic fc parameters (shapes from HeadBase.__init__)
    wfc = jax.random.normal(k3, (F, T), jnp.float32) / jnp.sqrt(float(F))
    bfc = 0.01 * jax.random.normal(k4, (1, T), jnp.float32)
    # prev read weights as in init_state: one-hot on row 0
    prev_w = jnp.zeros((B, R), jnp.float32).at[:, 0].set(1.0)

    read_out, w_out = read_head_forward(h, prev_w, mem, wfc, bfc)
    jax.block_until_ready((read_out, w_out))

    read_exp, w_exp = reference(h, prev_w, mem, wfc, bfc)
    assert read_out.shape == (B, C) and w_out.shape == (B, R)
    assert jnp.allclose(read_out, read_exp, atol=1e-3, rtol=1e-3)
    assert jnp.allclose(w_out, w_exp, atol=1e-3, rtol=1e-3)

    print("KERNEL_OK")
</pallas_src>

<mosaic_0001>
module attributes {stable_mosaic.version = 11 : i64} {
  func.func @read_head_kernel(%arg0: memref<2x49xf32, #tpu.memory_space<vmem>>, %arg1: memref<2x16xf32, #tpu.memory_space<vmem>>, %arg2: memref<2x16x16xf32, #tpu.memory_space<vmem>>, %arg3: memref<49x16xf32, #tpu.memory_space<vmem>>, %arg4: memref<49x6xf32, #tpu.memory_space<vmem>>, %arg5: memref<3x16x16xf32, #tpu.memory_space<vmem>>, %arg6: memref<2x32xf32, #tpu.memory_space<vmem>>) attributes {dimension_semantics = [], scalar_prefetch = 0 : i64, scratch_operands = 0 : i64, tpu.core_type = #tpu.core_type<tc>} {
    %c0 = arith.constant 0 : index
    %c0_0 = arith.constant 0 : index
    %0 = vector.load %arg0[%c0, %c0_0] : memref<2x49xf32, #tpu.memory_space<vmem>>, vector<2x49xf32>
    %c0_1 = arith.constant 0 : index
    %c0_2 = arith.constant 0 : index
    %1 = vector.load %arg1[%c0_1, %c0_2] : memref<2x16xf32, #tpu.memory_space<vmem>>, vector<2x16xf32>
    %c0_3 = arith.constant 0 : index
    %c0_4 = arith.constant 0 : index
    %c0_5 = arith.constant 0 : index
    %2 = vector.load %arg2[%c0_3, %c0_4, %c0_5] : memref<2x16x16xf32, #tpu.memory_space<vmem>>, vector<2x16x16xf32>
    %c0_6 = arith.constant 0 : index
    %c0_7 = arith.constant 0 : index
    %3 = vector.load %arg3[%c0_6, %c0_7] : memref<49x16xf32, #tpu.memory_space<vmem>>, vector<49x16xf32>
    %cst = arith.constant dense<0.000000e+00> : vector<2x16xf32>
    %4 = tpu.matmul %0, %3, %cst {dimension_numbers = #tpu.dot_dimension_numbers<[1], [0], [0], [1], [0, 0, 1, 1], [], []>} : vector<2x49xf32>, vector<49x16xf32>, vector<2x16xf32> -> vector<2x16xf32>
    %5 = math.tanh %4 : vector<2x16xf32>
    %c0_8 = arith.constant 0 : index
    %c0_9 = arith.constant 0 : index
    %6 = vector.load %arg4[%c0_8, %c0_9] : memref<49x6xf32, #tpu.memory_space<vmem>>, vector<49x6xf32>
    %cst_10 = arith.constant dense<0.000000e+00> : vector<2x6xf32>
    %7 = tpu.matmul %0, %6, %cst_10 {dimension_numbers = #tpu.dot_dimension_numbers<[1], [0], [0], [1], [0, 0, 1, 1], [], []>} : vector<2x49xf32>, vector<49x6xf32>, vector<2x6xf32> -> vector<2x6xf32>
    %8 = vector.extract_strided_slice %7 {offsets = [0, 0], sizes = [2, 1], strides = [1, 1]} : vector<2x6xf32> to vector<2x1xf32>
    %cst_11 = arith.constant 0.000000e+00 : f32
    %9 = vector.broadcast %cst_11 : f32 to vector<2x1xf32>
    %10 = arith.maximumf %8, %9 : vector<2x1xf32>
    %11 = vector.broadcast %cst_11 : f32 to vector<2x1xf32>
    %12 = arith.subf %8, %11 : vector<2x1xf32>
    %13 = arith.cmpf one, %12, %12 : vector<2x1xf32>
    %14 = vector.broadcast %cst_11 : f32 to vector<2x1xf32>
    %15 = arith.addf %8, %14 : vector<2x1xf32>
    %16 = math.absf %12 : vector<2x1xf32>
    %cst_12 = arith.constant 0.000000e+00 : f32
    %17 = vector.broadcast %cst_12 : f32 to vector<2x1xf32>
    %18 = arith.subf %17, %16 : vector<2x1xf32>
    %19 = math.exp %18 : vector<2x1xf32>
    %20 = math.log1p %19 : vector<2x1xf32>
    %21 = arith.addf %10, %20 : vector<2x1xf32>
    %22 = arith.select %13, %15, %21 : vector<2x1xi1>, vector<2x1xf32>
    %23 = vector.extract_strided_slice %7 {offsets = [0, 1], sizes = [2, 1], strides = [1, 1]} : vector<2x6xf32> to vector<2x1xf32>
    %24 = arith.negf %23 : vector<2x1xf32>
    %25 = math.exp %24 : vector<2x1xf32>
    %cst_13 = arith.constant 1.000000e+00 : f32
    %26 = vector.broadcast %cst_13 : f32 to vector<2x1xf32>
    %27 = arith.addf %26, %25 : vector<2x1xf32>
    %28 = arith.divf %26, %27 : vector<2x1xf32>
    %29 = vector.extract_strided_slice %7 {offsets = [0, 2], sizes = [2, 3], strides = [1, 1]} : vector<2x6xf32> to vector<2x3xf32>
    %cst_14 = arith.constant dense<0xFF800000> : vector<2xf32>
    %30 = vector.multi_reduction <maximumf>, %29, %cst_14 [1] : vector<2x3xf32> to vector<2xf32>
    %cst_15 = arith.constant 0xFF800000 : f32
    %31 = vector.broadcast %cst_15 : f32 to vector<2xf32>
    %32 = arith.maximumf %31, %30 : vector<2xf32>
    %33 = vector.shape_cast %32 : vector<2xf32> to vector<2x1xf32>
    %34 = vector.broadcast %33 : vector<2x1xf32> to vector<2x3xf32>
    %35 = arith.subf %29, %34 : vector<2x3xf32>
    %36 = math.exp %35 : vector<2x3xf32>
    %cst_16 = arith.constant dense<0.000000e+00> : vector<2xf32>
    %37 = vector.multi_reduction <add>, %36, %cst_16 [1] : vector<2x3xf32> to vector<2xf32>
    %38 = vector.shape_cast %37 : vector<2xf32> to vector<2x1xf32>
    %39 = vector.broadcast %38 : vector<2x1xf32> to vector<2x3xf32>
    %40 = arith.divf %36, %39 : vector<2x3xf32>
    %41 = vector.extract_strided_slice %7 {offsets = [0, 5], sizes = [2, 1], strides = [1, 1]} : vector<2x6xf32> to vector<2x1xf32>
    %cst_17 = arith.constant 0.000000e+00 : f32
    %42 = vector.broadcast %cst_17 : f32 to vector<2x1xf32>
    %43 = arith.maximumf %41, %42 : vector<2x1xf32>
    %44 = vector.broadcast %cst_17 : f32 to vector<2x1xf32>
    %45 = arith.subf %41, %44 : vector<2x1xf32>
    %46 = arith.cmpf one, %45, %45 : vector<2x1xf32>
    %47 = vector.broadcast %cst_17 : f32 to vector<2x1xf32>
    %48 = arith.addf %41, %47 : vector<2x1xf32>
    %49 = math.absf %45 : vector<2x1xf32>
    %cst_18 = arith.constant 0.000000e+00 : f32
    %50 = vector.broadcast %cst_18 : f32 to vector<2x1xf32>
    %51 = arith.subf %50, %49 : vector<2x1xf32>
    %52 = math.exp %51 : vector<2x1xf32>
    %53 = math.log1p %52 : vector<2x1xf32>
    %54 = arith.addf %43, %53 : vector<2x1xf32>
    %55 = arith.select %46, %48, %54 : vector<2x1xi1>, vector<2x1xf32>
    %cst_19 = arith.constant 1.000000e+00 : f32
    %56 = vector.broadcast %cst_19 : f32 to vector<2x1xf32>
    %57 = arith.addf %56, %55 : vector<2x1xf32>
    %58 = vector.shape_cast %5 : vector<2x16xf32> to vector<2x1x16xf32>
    "tpu.trace_start"() <{level = 10 : i32, message = "bqc,brc->bqr"}> : () -> ()
    %cst_20 = arith.constant dense<0.000000e+00> : vector<2x1x16xf32>
    %59 = tpu.matmul %58, %2, %cst_20 {dimension_numbers = #tpu.dot_dimension_numbers<[2], [2], [1], [1], [0, 0, 0, 1, 1, 1], [0], [0]>} : vector<2x1x16xf32>, vector<2x16x16xf32>, vector<2x1x16xf32> -> vector<2x1x16xf32>
    "tpu.trace_stop"() : () -> ()
    %60 = vector.shape_cast %59 : vector<2x1x16xf32> to vector<2x16xf32>
    %61 = arith.mulf %5, %5 : vector<2x16xf32>
    %cst_21 = arith.constant dense<0.000000e+00> : vector<2xf32>
    %62 = vector.multi_reduction <add>, %61, %cst_21 [1] : vector<2x16xf32> to vector<2xf32>
    %63 = vector.shape_cast %62 : vector<2xf32> to vector<2x1xf32>
    %64 = arith.mulf %2, %2 : vector<2x16x16xf32>
    %cst_22 = arith.constant dense<0.000000e+00> : vector<2x16xf32>
    %65 = vector.multi_reduction <add>, %64, %cst_22 [2] : vector<2x16x16xf32> to vector<2x16xf32>
    %66 = vector.broadcast %63 : vector<2x1xf32> to vector<2x16xf32>
    %67 = arith.mulf %66, %65 : vector<2x16xf32>
    %cst_23 = arith.constant 1.000000e-16 : f32
    %68 = vector.broadcast %cst_23 : f32 to vector<2x16xf32>
    %69 = arith.maximumf %67, %68 : vector<2x16xf32>
    %70 = math.rsqrt %69 : vector<2x16xf32>
    %71 = arith.mulf %60, %70 : vector<2x16xf32>
    %72 = vector.broadcast %22 : vector<2x1xf32> to vector<2x16xf32>
    %73 = arith.mulf %72, %71 : vector<2x16xf32>
    %cst_24 = arith.constant dense<0xFF800000> : vector<2xf32>
    %74 = vector.multi_reduction <maximumf>, %73, %cst_24 [1] : vector<2x16xf32> to vector<2xf32>
    %cst_25 = arith.constant 0xFF800000 : f32
    %75 = vector.broadcast %cst_25 : f32 to vector<2xf32>
    %76 = arith.maximumf %75, %74 : vector<2xf32>
    %77 = vector.shape_cast %76 : vector<2xf32> to vector<2x1xf32>
    %78 = vector.broadcast %77 : vector<2x1xf32> to vector<2x16xf32>
    %79 = arith.subf %73, %78 : vector<2x16xf32>
    %80 = math.exp %79 : vector<2x16xf32>
    %cst_26 = arith.constant dense<0.000000e+00> : vector<2xf32>
    %81 = vector.multi_reduction <add>, %80, %cst_26 [1] : vector<2x16xf32> to vector<2xf32>
    %82 = vector.shape_cast %81 : vector<2xf32> to vector<2x1xf32>
    %83 = vector.broadcast %82 : vector<2x1xf32> to vector<2x16xf32>
    %84 = arith.divf %80, %83 : vector<2x16xf32>
    %85 = vector.broadcast %28 : vector<2x1xf32> to vector<2x16xf32>
    %86 = arith.mulf %85, %84 : vector<2x16xf32>
    %cst_27 = arith.constant 1.000000e+00 : f32
    %87 = vector.broadcast %cst_27 : f32 to vector<2x1xf32>
    %88 = arith.subf %87, %28 : vector<2x1xf32>
    %89 = vector.broadcast %88 : vector<2x1xf32> to vector<2x16xf32>
    %90 = arith.mulf %89, %1 : vector<2x16xf32>
    %91 = arith.addf %86, %90 : vector<2x16xf32>
    %cst_28 = arith.constant 0.000000e+00 : f32
    %92 = vector.broadcast %cst_28 : f32 to vector<2x16xf32>
    %c0_29 = arith.constant 0 : index
    %c0_30 = arith.constant 0 : index
    %c0_31 = arith.constant 0 : index
    %93 = vector.load %arg5[%c0_29, %c0_30, %c0_31] : memref<3x16x16xf32, #tpu.memory_space<vmem>>, vector<1x16x16xf32>
    %94 = vector.shape_cast %93 : vector<1x16x16xf32> to vector<16x16xf32>
    %cst_32 = arith.constant dense<0.000000e+00> : vector<2x16xf32>
    %95 = tpu.matmul %91, %94, %cst_32 {dimension_numbers = #tpu.dot_dimension_numbers<[1], [0], [0], [1], [0, 0, 1, 1], [], []>} : vector<2x16xf32>, vector<16x16xf32>, vector<2x16xf32> -> vector<2x16xf32>
    %96 = vector.extract_strided_slice %40 {offsets = [0, 0], sizes = [2, 1], strides = [1, 1]} : vector<2x3xf32> to vector<2x1xf32>
    %97 = vector.broadcast %96 : vector<2x1xf32> to vector<2x16xf32>
    %98 = arith.mulf %97, %95 : vector<2x16xf32>
    %99 = arith.addf %92, %98 : vector<2x16xf32>
    %c1 = arith.constant 1 : index
    %c0_33 = arith.constant 0 : index
    %c0_34 = arith.constant 0 : index
    %100 = vector.load %arg5[%c1, %c0_33, %c0_34] : memref<3x16x16xf32, #tpu.memory_space<vmem>>, vector<1x16x16xf32>
    %101 = vector.shape_cast %100 : vector<1x16x16xf32> to vector<16x16xf32>
    %cst_35 = arith.constant dense<0.000000e+00> : vector<2x16xf32>
    %102 = tpu.matmul %91, %101, %cst_35 {dimension_numbers = #tpu.dot_dimension_numbers<[1], [0], [0], [1], [0, 0, 1, 1], [], []>} : vector<2x16xf32>, vector<16x16xf32>, vector<2x16xf32> -> vector<2x16xf32>
    %103 = vector.extract_strided_slice %40 {offsets = [0, 1], sizes = [2, 1], strides = [1, 1]} : vector<2x3xf32> to vector<2x1xf32>
    %104 = vector.broadcast %103 : vector<2x1xf32> to vector<2x16xf32>
    %105 = arith.mulf %104, %102 : vector<2x16xf32>
    %106 = arith.addf %99, %105 : vector<2x16xf32>
    %c2 = arith.constant 2 : index
    %c0_36 = arith.constant 0 : index
    %c0_37 = arith.constant 0 : index
    %107 = vector.load %arg5[%c2, %c0_36, %c0_37] : memref<3x16x16xf32, #tpu.memory_space<vmem>>, vector<1x16x16xf32>
    %108 = vector.shape_cast %107 : vector<1x16x16xf32> to vector<16x16xf32>
    %cst_38 = arith.constant dense<0.000000e+00> : vector<2x16xf32>
    %109 = tpu.matmul %91, %108, %cst_38 {dimension_numbers = #tpu.dot_dimension_numbers<[1], [0], [0], [1], [0, 0, 1, 1], [], []>} : vector<2x16xf32>, vector<16x16xf32>, vector<2x16xf32> -> vector<2x16xf32>
    %110 = vector.extract_strided_slice %40 {offsets = [0, 2], sizes = [2, 1], strides = [1, 1]} : vector<2x3xf32> to vector<2x1xf32>
    %111 = vector.broadcast %110 : vector<2x1xf32> to vector<2x16xf32>
    %112 = arith.mulf %111, %109 : vector<2x16xf32>
    %113 = arith.addf %106, %112 : vector<2x16xf32>
    %cst_39 = arith.constant 1.000000e-30 : f32
    %114 = vector.broadcast %cst_39 : f32 to vector<2x16xf32>
    %115 = arith.maximumf %113, %114 : vector<2x16xf32>
    %116 = vector.broadcast %57 : vector<2x1xf32> to vector<2x16xf32>
    %117 = math.powf %115, %116 : vector<2x16xf32>
    %cst_40 = arith.constant dense<0.000000e+00> : vector<2xf32>
    %118 = vector.multi_reduction <add>, %117, %cst_40 [1] : vector<2x16xf32> to vector<2xf32>
    %119 = vector.shape_cast %118 : vector<2xf32> to vector<2x1xf32>
    %cst_41 = arith.constant 1.000000e-16 : f32
    %120 = vector.broadcast %cst_41 : f32 to vector<2x1xf32>
    %121 = arith.addf %119, %120 : vector<2x1xf32>
    %122 = vector.broadcast %121 : vector<2x1xf32> to vector<2x16xf32>
    %123 = arith.divf %117, %122 : vector<2x16xf32>
    %124 = vector.shape_cast %123 : vector<2x16xf32> to vector<2x1x16xf32>
    "tpu.trace_start"() <{level = 10 : i32, message = "bqr,brc->bqc"}> : () -> ()
    %cst_42 = arith.constant dense<0.000000e+00> : vector<2x1x16xf32>
    %125 = tpu.matmul %124, %2, %cst_42 {dimension_numbers = #tpu.dot_dimension_numbers<[2], [1], [1], [2], [0, 0, 0, 1, 1, 2], [0], [0]>} : vector<2x1x16xf32>, vector<2x16x16xf32>, vector<2x1x16xf32> -> vector<2x1x16xf32>
    "tpu.trace_stop"() : () -> ()
    %126 = vector.shape_cast %125 : vector<2x1x16xf32> to vector<2x16xf32>
    %127 = tpu.concatenate %126, %123 in 1 : vector<2x16xf32>, vector<2x16xf32> -> vector<2x32xf32>
    %c0_43 = arith.constant 0 : index
    %c0_44 = arith.constant 0 : index
    %128 = vector.load %arg6[%c0_43, %c0_44] : memref<2x32xf32, #tpu.memory_space<vmem>>, vector<2x32xf32>
    tpu.vector_store %arg6[%c0_43, %c0_44], %127 {strides = array<i32>} : memref<2x32xf32, #tpu.memory_space<vmem>>, vector<2x32xf32>,
    return
  }
}

</mosaic_0001>

<bundles_post_ra>
// kernel: read_head_forward.1
= control target key start
LH: loop header
LB: loop body
LE: loop exit
PB: predicated region body
PF: predicated region fallthrough
CT: control target
= control target key end

     0   :  { %vm40_vm0 = vcmask 1040384   ;;  %vm165_vm1 = vcmask 130048   ;;  %vm36_vm2 = vcmask 400384   ;;  %v665_v27 = vmov 0   ;;  %s899_s3 = inlined_call_operand.vmem [shape: f32[49,16], index: 3, kind: input, shape index: {}]   ;;  %s900_s4 = inlined_call_operand.vmem [shape: f32[49,6], index: 4, kind: input, shape index: {}]   ;;  %s901_s2 = inlined_call_operand.vmem [shape: f32[2,16,16], index: 2, kind: input, shape index: {}]   ;;  %s902_s0 = inlined_call_operand.vmem [shape: f32[2,49], index: 0, kind: input, shape index: {}]   ;;  %s903_s5 = inlined_call_operand.vmem [shape: f32[3,16,16], index: 5, kind: input, shape index: {}]   ;;  %s904_s1 = inlined_call_operand.vmem [shape: f32[2,16], index: 1, kind: input, shape index: {}]   ;;  %s905_s6 = inlined_call_operand.vmem [shape: f32[2,32], index: 6, kind: output, shape index: {}]  }
   0x1   :  { %v35_v0 = vld [vmem:[%s899_s3 + $0x30] sm:$0x1]  ;;  %v34_v1 = vld [vmem:[%s899_s3 + $0x28] sm:$0xff]  ;;  %v33_v3 = vld [vmem:[%s899_s3 + $0x20] sm:$0xff]  ;;  %634 = vset.pattern.permute.xlu2 %v665_v27  ;;  %vm223_vm3 = vcmask 123904   ;;  %v247_v51 = vlaneseq  ;;  %vm252_vm6 = vcmask 130112  }
   0x2   :  { %504 = vmatpush.msk.msra.mxu0 %vm40_vm0, %v35_v0  ;;  %v71_v2 = vld [vmem:[%s900_s4 + $0x30] sm:$0x1]  ;;  %v70_v4 = vld [vmem:[%s900_s4 + $0x28] sm:$0xff]  ;;  %v69_v5 = vld [vmem:[%s900_s4 + $0x20] sm:$0xff]  ;;  %vm906_vm7 = vcmask 1041409   ;;  %vm132_vm11 = vcmask 33808  }
   0x3   :  { %506 = vmatpush.msk.msra.mxu1 %vm40_vm0, %v71_v2  ;;  %v32_v6 = vld [vmem:[%s899_s3 + $0x18] sm:$0xff]  ;;  %v736_v8 = vld [vmem:[%s901_s2 + $0x10] sm:$0xff]  ;;  %v25_v9 = vld [vmem:[%s901_s2] sm:$0xff]  ;;  %v248_v52 = vand.u32 127, %v247_v51  ;;  %v666_v2 = vmov 1   ;;  %vm143_vm0 = vcmask 17408  }
   0x4   :  { %54 = vmatpush.msra.mxu0 %v34_v1  ;;  %v68_v7 = vld [vmem:[%s900_s4 + $0x18] sm:$0xff]  ;;  %v31_v11 = vld [vmem:[%s899_s3 + $0x10] sm:$0xff]  ;;  %v229_v12 = vmul.f32 %v736_v8, %v736_v8  ;;  %v227_v13 = vmul.f32 %v25_v9, %v25_v9  ;;  %v26_v14 = vld [vmem:[%s901_s2 + $0x8] sm:$0xff]  ;;  %636 = vset.pattern.permute.xlu0 %v666_v2 }
   0x5   :  { %85 = vmatpush.msra.mxu1 %v70_v4  ;;  %v744_v10 = vld [vmem:[%s901_s2 + $0x18] sm:$0xff]  ;;  %v67_v15 = vld [vmem:[%s900_s4 + $0x10] sm:$0xff]  ;;  %509 = vmatpush.xpose.msk.msra.mxu2 %vm165_vm1, %v26_v14  ;;  %v30_v16 = vld [vmem:[%s899_s3 + $0x8] sm:$0xff]  ;;  %v228_v24 = vmul.f32 %v26_v14, %v26_v14  ;;  %v250_v53 = vadd.s32 4294967288, %v248_v52 }
   0x6   :  { %55 = vmatpush.msra.mxu0 %v33_v3  ;;  %512 = vmatpush.xpose.msk.msra.mxu3 %vm165_vm1, %v744_v10  ;;  %v237_v17 = vsel %vm165_vm1, %v229_v12, 0.0  ;;  %v231_v18 = vsel %vm165_vm1, %v227_v13, 0.0  ;;  %v66_v19 = vld [vmem:[%s900_s4 + $0x8] sm:$0xff]  ;;  %v29_v20 = vld [vmem:[%s899_s3] sm:$0xff]  ;;  %v230_v21 = vmul.f32 %v744_v10, %v744_v10 }
   0x7   :  { %86 = vmatpush.msra.mxu1 %v69_v5  ;;  %238 = vadd.xlane.f32.xlu1 %v237_v17  ;;  %v23_v22 = vld [vmem:[%s902_s0] sm:$0x3]  ;;  %v234_v26 = vsel %vm165_vm1, %v228_v24, 0.0  ;;  %s668_s0 = smov 126  }
   0x8   :  { %56 = vmatpush.msra.mxu0 %v32_v6  ;;  %232 = vadd.xlane.f32.xlu0 %v231_v18  ;;  %v65_v23 = vld [vmem:[%s900_s4] sm:$0xff]  ;;  %v240_v25 = vsel %vm165_vm1, %v230_v21, 0.0 }
   0x9   :  { %87 = vmatpush.msra.mxu1 %v68_v7  ;;  %510 = vmatpush.xpose.msk.msra.mxu2 %vm165_vm1, %v25_v9 }
   0xa   :  { %57 = vmatpush.msra.mxu0 %v31_v11  ;;  %513 = vmatpush.xpose.msk.msra.mxu3 %vm165_vm1, %v736_v8 }
   0xb   :  { %88 = vmatpush.msra.mxu1 %v67_v15  ;;  %635 = vset.pattern.permute.xlu1 %v666_v2 }
   0xc   :  { %58 = vmatpush.msra.mxu0 %v30_v16 }
   0xd   :  { %89 = vmatpush.msra.mxu1 %v66_v19 }
   0xe   :  { %59 = vmatpush.msra.mxu0 %v29_v20 }
   0xf   :  { %505 = vmatmul.msk.f32.vlgmr.msra.gmra.mxu0 %vm36_vm2, %v23_v22  ;;  %90 = vmatpush.msra.mxu1 %v65_v23 }
  0x10   :  { %507 = vmatmul.msk.f32.vlgmr.msra.gmra.mxu1 %vm36_vm2, %v23_v22  ;;  %241 = vadd.xlane.f32.xlu1 %v240_v25 }
  0x11   :  { %461 = vmatpush.msrb.mxu1 %v26_v14  ;;  %235 = vadd.xlane.f32.xlu0 %v234_v26 }
  0x13   :  { %462 = vmatpush.msrb.mxu1 %v25_v9 }
  0x7a   :  { %v239_v49 = vpop.xlane.xlu1 %238 }
  0x7b   :  { %v233_v50 = vpop.xlane.xlu0 %232  ;;  %v254_v56 = vperm.slane %v239_v49, %v248_v52 }
  0x7c   :  { %v249_v57 = vperm.slane %v233_v50, %v248_v52  ;;  %v517_v52 = vld [vmem:[%s903_s5 + $0x18] sm:$0xff] }
  0x7d   :  { %376 = vmatpush.msrb.mxu3 %v517_v52 }
  0x83   :  { %v242_v54 = vpop.xlane.xlu1 %241 }
  0x84   :  { %v236_v55 = vpop.xlane.xlu0 %235  ;;  %v255_v58 = vperm.slane %v242_v54, %v250_v53  ;;  %v327_v54 = vld [vmem:[%s903_s5] sm:$0xff] }
  0x85   :  { %v251_v59 = vperm.slane %v236_v55, %v250_v53  ;;  %v520_v53 = vld [vmem:[%s903_s5 + $0x28] sm:$0xff]  ;;  %v516_v55 = vld [vmem:[%s903_s5 + $0x10] sm:$0xff] }
  0x86   :  { %v256_v61 = vsel %vm252_vm6, %v255_v58, %v254_v56  ;;  %405 = vmatpush.msrb.mxu0 %v520_v53  ;;  %v519_v56 = vld [vmem:[%s903_s5 + $0x20] sm:$0xff]  ;;  %377 = vmatpush.msrb.mxu3 %v516_v55 }
  0x87   :  { %v253_v60 = vsel %vm252_vm6, %v251_v59, %v249_v57 }
  0x88   :  { %v258_v62 = vsel %vm906_vm7, %v256_v61, %v253_v60  ;;  %406 = vmatpush.msrb.mxu0 %v519_v56 }
  0x8c   :  { %v61_v28 = vpop.f32.mrf.mxu0 }
  0x8d   :  { %641 = vtanh.f32 %v61_v28  ;;  %v785_v29 = vpop.f32.mrf.mxu1 }
  0x8e   :  { %v98_v30 = vand.u32 2147483647, %v785_v29  ;;  %v95_v44 = vmax.f32 %v785_v29, 0.0  ;;  %vm96_vm5 = vcmp.ne.f32.partialorder %v785_v29, %v785_v29  ;;  %v508_v4 = vmul.f32 -1.442695, %v785_v29 }
  0x8f   :  { %v133_v28 = vsel %vm132_vm11, %v785_v29, -inf }
  0x90   :  { %v99_v31 = vsub.f32 0.0, %v98_v30 }
  0x92   :  { %v100_v32 = vmul.f32 1.442695, %v99_v31 }
  0x93   :  { %v642_v33 = vpop.eup %641 }
  0x94   :  { %511 = vmatmul.msk.f32.vlgmr.msra.gmra.mxu2 %vm165_vm1, %v642_v33  ;;  %643 = vpow2.f32 %v100_v32  ;;  %v164_v34 = vrot.slane %v642_v33, 1  ;;  %v222_v35 = vmul.f32 %v642_v33, %v642_v33 }
  0x96   :  { %514 = vmatmul.msk.f32.vlgmr.msra.gmra.mxu3 %vm165_vm1, %v164_v34  ;;  %v224_v36 = vsel %vm223_vm3, %v222_v35, 0.0 }
  0x97   :  { %225 = vadd.xlane.f32.xlu2 %v224_v36 }
  0x9a   :  { %v644_v37 = vpop.eup %643 }
  0x9b   :  { %v102_v38 = vadd.f32 1.0, %v644_v37  ;;  %v105_v39 = vmul.f32 -0.5, %v644_v37  ;;  %v108_v41 = vand.u32 2147483647, %v644_v37 }
  0x9d   :  { %645 = vlog2.f32 %v102_v38  ;;  %v106_v40 = vadd.f32 1.0, %v105_v39  ;;  %vm109_vm4 = vcmp.lt.f32.partialorder %v108_v41, 0.0004427343 }
  0x9f   :  { %v107_v42 = vmul.f32 %v644_v37, %v106_v40  ;;  %v667_v40 = vmov 5  }
  0xa3   :  { %v646_v43 = vpop.eup %645 }
  0xa4   :  { %v104_v45 = vmul.f32 0.6931472, %v646_v43 }
  0xa6   :  { %v110_v46 = vsel %vm109_vm4, %v107_v42, %v104_v45 }
  0xa7   :  { %v111_v47 = vadd.f32 %v110_v46, %v95_v44 }
  0xa9   :  { %v795_v48 = vsel %vm96_vm5, %v785_v29, %v111_v47 }
  0xaa   :  { %v162_v39 = vadd.f32 1.0, %v795_v48 }
  0xaf   :  { %280 = vperm.xlu2 %634, %v795_v48  }
 0x10a   :  { %v226_v63 = vpop.xlane.xlu2 %225 }
 0x10b   :  { %v260_v0 = vmul.f32 %v258_v62, %v226_v63 }
 0x10d   :  { %v261_v1 = vmax.f32 %v260_v0, 1e-16 }
 0x10f   :  { %647 = vrsqrt.f32 %v261_v1  ;;  %vm268_vm9 = vweird.f32 %v261_v1 }
 0x110   :  { %649 = vpow2.f32 %v508_v4 }
 0x112   :  { %v281_v21 = vpop.permute.xlu2 %280 }
 0x115   :  { %v648_v3 = vpop.eup %647 }
 0x116   :  { %v263_v5 = vmul.f32 %v648_v3, %v261_v1  ;;  %vm269_vm8 = vweird.f32 %v648_v3  ;;  %v650_v12 = vpop.eup %649 }
 0x117   :  { %vm270_vm10 = vmor %vm268_vm9, %vm269_vm8  ;;  %v116_v15 = vadd.f32 1.0, %v650_v12  ;;  %v191_v18 = vpop.f32.mrf.mxu2 }
 0x118   :  { %v264_v6 = vmul.f32 %v648_v3, %v263_v5 }
 0x119   :  { %v219_v16 = vpop.f32.mrf.mxu3  ;;  %651 = vrcp.f32 %v116_v15  ;;  %vm122_vm12 = vweird.f32 %v116_v15  ;;  %v128_v32 = vand.u32 2147483648, %v116_v15  ;;  %v126_v34 = vand.u32 2147483647, %v116_v15 }
 0x11a   :  { %v265_v7 = vmul.f32 0.5, %v264_v6 }
 0x11b   :  { %v129_v35 = vor.u32 1.1754944e-38, %v128_v32  ;;  %vm127_vm15 = vcmp.eq.f32.partialorder %v126_v34, 8.507059e+37 }
 0x11c   :  { %v266_v9 = vsub.f32 1.5, %v265_v7 }
 0x11e   :  { %v267_v11 = vmul.f32 %v648_v3, %v266_v9 }
 0x11f   :  { %v652_v25 = vpop.eup %651 }
 0x120   :  { %v271_v13 = vsel %vm270_vm10, %v648_v3, %v267_v11  ;;  %v118_v26 = vmul.f32 %v652_v25, %v116_v15  ;;  %vm123_vm13 = vweird.f32 %v652_v25  ;;  %v669_v11 = vmov 2  }
 0x121   :  { %v273_v14 = vrot.slane %v271_v13, 1  ;;  %v276_v19 = vmul.f32 %v271_v13, %v191_v18  ;;  %vm124_vm14 = vmor %vm122_vm12, %vm123_vm13 }
 0x122   :  { %v119_v30 = vsub.f32 1.0, %v118_v26 }
 0x123   :  { %v277_v17 = vmul.f32 %v273_v14, %v219_v16 }
 0x124   :  { %v120_v31 = vmul.f32 %v652_v25, %v119_v30 }
 0x125   :  { %v285_v20 = vrot.slane %v277_v17, 7 }
 0x126   :  { %v121_v33 = vadd.f32 %v652_v25, %v120_v31 }
 0x127   :  { %v286_v22 = vsel %vm906_vm7, %v285_v20, %v276_v19 }
 0x128   :  { %v288_v23 = vmul.f32 %v286_v22, %v281_v21  ;;  %v125_v36 = vsel %vm124_vm14, %v652_v25, %v121_v33  ;;  %v671_v25 = vmov 4  }
 0x129   :  { %v130_v37 = vsel %vm127_vm15, %v129_v35, %v125_v36 }
 0x12a   :  { %v289_v24 = vsel %vm223_vm3, %v288_v23, -inf  ;;  %v319_v38 = vsub.f32 1.0, %v130_v37 }
 0x12b   :  { %290 = vmax.xlane.f32.xlu0 %v289_v24  ;;  %v670_v24 = vmov 3  }
 0x133   :  { %134 = vmax.xlane.f32.xlu0 %v133_v28 }
 0x147   :  { %322 = vperm.xlu0 %636, %v319_v38  }
 0x14f   :  { %640 = vset.pattern.permute.xlu0 %v667_v40 }
 0x150   :  { %420 = vperm.xlu0 %640, %v162_v39  }
 0x19e   :  { %v291_v41 = vpop.xlane.xlu0 %290 }
 0x19f   :  { %v292_v42 = vsub.f32 %v288_v23, %v291_v41 }
 0x1a1   :  { %v293_v43 = vmul.f32 1.442695, %v292_v42 }
 0x1a3   :  { %653 = vpow2.f32 %v293_v43 }
 0x1a6   :  { %v135_v44 = vpop.xlane.xlu0 %134 }
 0x1a7   :  { %v136_v45 = vsub.f32 %v785_v29, %v135_v44  ;;  %v328_v29 = vld [vmem:[%s903_s5 + $0x8] sm:$0xff] }
 0x1a8   :  { %346 = vmatpush.msrb.mxu2 %v328_v29 }
 0x1a9   :  { %v654_v46 = vpop.eup %653  ;;  %v137_v47 = vmul.f32 1.442695, %v136_v45 }
 0x1aa   :  { %v295_v49 = vsel %vm223_vm3, %v654_v46, 0.0  ;;  %347 = vmatpush.msrb.mxu2 %v327_v54 }
 0x1ab   :  { %655 = vpow2.f32 %v137_v47  ;;  %296 = vadd.xlane.f32.xlu1 %v295_v49 }
 0x1ac   :  { %483 = vmatpush.msra.mxu2 %v744_v10 }
 0x1ae   :  { %484 = vmatpush.msra.mxu2 %v736_v8  ;;  %v24_v8 = vld [vmem:[%s904_s1] sm:$0x3]  ;;  %s673_s1 = smov 16  }
 0x1b1   :  { %v806_v50 = vpop.eup %655 }
 0x1b2   :  { %140 = vrot.lane.b32.xlu2 %v806_v50, %s668_s0 }
 0x1b9   :  { %v323_v10 = vpop.permute.xlu0 %322 }
 0x1ba   :  { %v325_v6 = vmul.f32 %v323_v10, %v24_v8 }
 0x1c4   :  { %315 = vperm.xlu1 %635, %v130_v37  }
 0x1cc   :  { %637 = vset.pattern.permute.xlu1 %v669_v11 }
 0x20c   :  { %v141_v48 = vpop.permute.xlu2 %140 }
 0x20d   :  { %v144_v51 = vsel %vm143_vm0, %v141_v48, 0.0 }
 0x20e   :  { %145 = vadd.xlane.f32.xlu2 %v144_v51 }
 0x21e   :  { %v297_v57 = vpop.xlane.xlu1 %296 }
 0x21f   :  { %657 = vrcp.f32 %v297_v57  ;;  %v309_v63 = vand.u32 2147483648, %v297_v57  ;;  %vm303_vm4 = vweird.f32 %v297_v57  ;;  %v307_v0 = vand.u32 2147483647, %v297_v57 }
 0x221   :  { %v310_v2 = vor.u32 1.1754944e-38, %v309_v63  ;;  %vm308_vm6 = vcmp.eq.f32.partialorder %v307_v0, 8.507059e+37 }
 0x225   :  { %v658_v58 = vpop.eup %657 }
 0x226   :  { %v299_v59 = vmul.f32 %v658_v58, %v297_v57  ;;  %vm304_vm2 = vweird.f32 %v658_v58 }
 0x227   :  { %vm305_vm5 = vmor %vm303_vm4, %vm304_vm2 }
 0x228   :  { %v300_v60 = vsub.f32 1.0, %v299_v59 }
 0x22a   :  { %v301_v61 = vmul.f32 %v658_v58, %v300_v60 }
 0x22c   :  { %v302_v62 = vadd.f32 %v658_v58, %v301_v61  ;;  %v844_v61 = vpop.permute.xlu0 %420 }
 0x22d   :  { %vm576_vm13 = vcmp.lt.s32.totalorder %v844_v61, 0 }
 0x22e   :  { %v306_v1 = vsel %vm305_vm5, %v658_v58, %v302_v62 }
 0x22f   :  { %v311_v3 = vsel %vm308_vm6, %v310_v2, %v306_v1  ;;  %v571_v2 = vand.u32 2147483647, %v844_v61 }
 0x230   :  { %v312_v4 = vmul.f32 %v654_v46, %v311_v3 }
 0x231   :  { %vm572_vm2 = vcmp.eq.f32.partialorder %v571_v2, 2139095040  ;;  %vm582_vm7 = vcmp.lt.f32.partialorder %v571_v2, 1266679808 }
 0x236   :  { %v316_v5 = vpop.permute.xlu1 %315 }
 0x237   :  { %v318_v7 = vmul.f32 %v316_v5, %v312_v4  ;;  %v577_v5 = vceil.f32 %v844_v61 }
 0x239   :  { %v326_v9 = vadd.f32 %v325_v6, %v318_v7  ;;  %v578_v6 = vfloor.f32 %v844_v61  ;;  %v584_v7 = vfloor.f32 %v571_v2 }
 0x23b   :  { %515 = vmatmul.msk.f32.vlgmr.msrb.gmra.mxu2 %vm165_vm1, %v326_v9  ;;  %518 = vmatmul.msk.f32.vlgmr.msrb.gmra.mxu3 %vm165_vm1, %v326_v9 }
 0x23c   :  { %521 = vmatmul.msk.f32.vlgmr.msrb.gmra.mxu0 %vm165_vm1, %v326_v9 }
 0x281   :  { %v146_v12 = vpop.xlane.xlu2 %145 }
 0x282   :  { %659 = vrcp.f32 %v146_v12  ;;  %v158_v16 = vand.u32 2147483648, %v146_v12  ;;  %v156_v18 = vand.u32 2147483647, %v146_v12  ;;  %vm152_vm9 = vweird.f32 %v146_v12 }
 0x284   :  { %v159_v20 = vor.u32 1.1754944e-38, %v158_v16  ;;  %vm157_vm11 = vcmp.eq.f32.partialorder %v156_v18, 8.507059e+37 }
 0x288   :  { %v660_v13 = vpop.eup %659 }
 0x289   :  { %v148_v14 = vmul.f32 %v660_v13, %v146_v12  ;;  %vm153_vm8 = vweird.f32 %v660_v13 }
 0x28a   :  { %vm154_vm10 = vmor %vm152_vm9, %vm153_vm8 }
 0x28b   :  { %v149_v15 = vsub.f32 1.0, %v148_v14  ;;  %v585_v14 = vcvt.f32.s32 %v584_v7 }
 0x28d   :  { %v150_v17 = vmul.f32 %v660_v13, %v149_v15  ;;  %v586_v18 = vand.u32 1, %v585_v14 }
 0x28f   :  { %v151_v19 = vadd.f32 %v660_v13, %v150_v17  ;;  %vm587_vm9 = vcmp.eq.s32.totalorder %v586_v18, 1 }
 0x291   :  { %v155_v21 = vsel %vm154_vm10, %v660_v13, %v151_v19  ;;  %v579_v13 = vsel %vm576_vm13, %v577_v5, %v578_v6  ;;  %vm575_vm10 = vcmp.lt.f32.partialorder %v844_v61, 0 }
 0x292   :  { %v160_v22 = vsel %vm157_vm11, %v159_v20, %v155_v21  ;;  %vm580_vm4 = vcmp.ne.f32.partialorder %v844_v61, %v579_v13 }
 0x293   :  { %v161_v23 = vmul.f32 %v806_v50, %v160_v22  ;;  %vm581_vm6 = vmor %vm580_vm4, %vm572_vm2 }
 0x294   :  { %vm588_vm11 = vmneg %vm581_vm6 }
 0x295   :  { %354 = vperm.xlu1 %637, %v161_v23  }
 0x29d   :  { %638 = vset.pattern.permute.xlu1 %v670_v24 }
 0x29e   :  { %383 = vperm.xlu1 %638, %v161_v23  }
 0x2a6   :  { %639 = vset.pattern.permute.xlu1 %v671_v25 }
 0x2a7   :  { %412 = vperm.xlu1 %639, %v161_v23   ;;  %v672_v23 = vmov 2139095040  }
 0x2a8   :  { %v611_v24 = vsel %vm575_vm10, 0, %v672_v23 }
 0x2b9   :  { %v408_v34 = vpop.f32.mrf.mxu0 }
 0x2be   :  { %v379_v30 = vpop.f32.mrf.mxu3  ;;  %v349_v32 = vpop.f32.mrf.mxu2 }
 0x307   :  { %v355_v26 = vpop.permute.xlu1 %354 }
 0x308   :  { %v357_v33 = vmul.f32 %v355_v26, %v349_v32  ;;  %v599_v26 = vsel %vm575_vm10, 2139095040, %v665_v27  ;;  %v612_v32 = vxor.u32 2147483648, %v611_v24 }
 0x310   :  { %v384_v28 = vpop.permute.xlu1 %383 }
 0x311   :  { %v386_v31 = vmul.f32 %v384_v28, %v379_v30 }
 0x313   :  { %v387_v36 = vadd.f32 %v386_v31, %v357_v33 }
 0x319   :  { %v413_v35 = vpop.permute.xlu1 %412 }
 0x31a   :  { %v415_v37 = vmul.f32 %v413_v35, %v408_v34 }
 0x31c   :  { %v416_v38 = vadd.f32 %v415_v37, %v387_v36 }
 0x31e   :  { %v836_v39 = vmax.f32 %v416_v38, 1e-30 }
 0x320   :  { %v839_v40 = vand.u32 2147483647, %v836_v39 }
 0x322   :  { %v530_v41 = vand.u32 8388607, %v839_v40  ;;  %v526_v50 = vand.u32 2139095040, %v839_v40  ;;  %vm564_vm14 = vweird.f32 %v839_v40  ;;  %vm563_vm15 = vcmp.lt.f32.partialorder %v839_v40, 0.0 }
 0x323   :  { %vm562_vm0 = vcmp.eq.f32.partialorder %v839_v40, 0.0  ;;  %vm561_vm5 = vcmp.eq.f32.partialorder %v839_v40, 1.0  ;;  %vm595_vm8 = vcmp.gt.f32.partialorder %v839_v40, 1065353216 }
 0x324   :  { %v531_v42 = vor.u32 8388608, %v530_v41  ;;  %v527_v53 = vshrl.u32 %v526_v50, 23  ;;  %vm862_vm13 = vmxor %vm575_vm10, %vm595_vm8  ;;  %vm594_vm8 = vcmp.lt.s32.totalorder %v836_v39, 0 }
 0x326   :  { %v533_v43 = vand.u32 8388607, %v531_v42  ;;  %v623_v58 = vadd.s32 4294967169, %v527_v53 }
 0x328   :  { %v534_v44 = vor.u32 1065353216, %v533_v43  ;;  %v538_v0 = vadd.s32 1, %v623_v58 }
 0x32a   :  { %vm535_vm12 = vcmp.ge.f32.partialorder %v534_v44, 1.4142135  ;;  %v536_v45 = vmul.f32 0.5, %v534_v44 }
 0x32b   :  { %v539_v10 = vsel %vm535_vm12, %v538_v0, %v623_v58 }
 0x32c   :  { %v537_v46 = vsel %vm535_vm12, %v536_v45, %v534_v44  ;;  %v559_v11 = vcvt.s32.f32 %v539_v10  ;;  %vm592_vm12 = vcmp.eq.f32.partialorder %v836_v39, 0 }
 0x32d   :  { %v624_v47 = vadd.f32 -1.0, %v537_v46 }
 0x32f   :  { %v541_v49 = vmul.f32 %v624_v47, %v624_v47 }
 0x331   :  { %v542_v48 = vmul.f32 0.12621109, %v541_v49  ;;  %v544_v51 = vmul.f32 -0.20706727, %v541_v49 }
 0x333   :  { %v543_v29 = vadd.f32 0.21545328, %v542_v48  ;;  %v545_v52 = vadd.f32 -0.23896284, %v544_v51 }
 0x335   :  { %v546_v54 = vmul.f32 %v543_v29, %v541_v49  ;;  %v548_v55 = vmul.f32 %v545_v52, %v541_v49 }
 0x337   :  { %v547_v56 = vadd.f32 0.28795174, %v546_v54  ;;  %v549_v57 = vadd.f32 -0.3607037, %v548_v55 }
 0x339   :  { %v550_v59 = vmul.f32 %v547_v56, %v541_v49  ;;  %v552_v60 = vmul.f32 %v549_v57, %v541_v49 }
 0x33b   :  { %v551_v62 = vadd.f32 0.48090908, %v550_v59  ;;  %v553_v63 = vadd.f32 -0.72134733, %v552_v60 }
 0x33d   :  { %v554_v1 = vmul.f32 %v551_v62, %v541_v49  ;;  %v556_v8 = vmul.f32 %v624_v47, %v553_v63 }
 0x33f   :  { %v555_v3 = vadd.f32 1.442695, %v554_v1 }
 0x341   :  { %v557_v4 = vadd.f32 %v556_v8, %v555_v3 }
 0x343   :  { %v558_v9 = vmul.f32 %v624_v47, %v557_v4 }
 0x345   :  { %v560_v12 = vadd.f32 %v559_v11, %v558_v9 }
 0x347   :  { %v565_v15 = vsel %vm564_vm14, %v839_v40, %v560_v12  ;;  %vm589_vm14 = vmand %vm587_vm9, %vm588_vm11 }
 0x348   :  { %v566_v16 = vsel %vm563_vm15, nan, %v565_v15  ;;  %vm591_vm15 = vcmp.lt.f32.partialorder %v836_v39, 0  ;;  %vm590_vm9 = vmand %vm582_vm7, %vm589_vm14  ;;  %vm596_vm7 = vcmp.eq.f32.partialorder %v839_v40, 2139095040 }
 0x349   :  { %v567_v17 = vsel %vm562_vm0, -inf, %v566_v16  ;;  %vm604_vm0 = vmand %vm575_vm10, %vm592_vm12  ;;  %v613_v35 = vsel %vm590_vm9, %v612_v32, %v611_v24  ;;  %vm617_vm10 = vcmp.ne.f32.partialorder %v844_v61, %v844_v61 }
 0x34a   :  { %v568_v19 = vsel %vm561_vm5, 0.0, %v567_v17  ;;  %vm606_vm4 = vmor %vm604_vm0, %vm862_vm13  ;;  %vm608_vm13 = vcmp.eq.f32.partialorder %v836_v39, 3212836864  ;;  %vm593_vm0 = vcmp.eq.f32.partialorder %v836_v39, 1065353216 }
 0x34b   :  { %v569_v20 = vmul.f32 %v568_v19, %v844_v61  ;;  %vm597_vm5 = vmand %vm591_vm15, %vm581_vm6  ;;  %v607_v30 = vsel %vm606_vm4, 2139095040, %v665_v27  ;;  %vm616_vm6 = vcmp.ne.f32.partialorder %v836_v39, %v836_v39  ;;  %v614_v27 = vsel %vm591_vm15, %v613_v35, %v611_v24 }
 0x34c   :  { %vm601_vm11 = vmand %vm594_vm8, %vm590_vm9  ;;  %v609_v34 = vsel %vm608_vm13, 1065353216, %v607_v30 }
 0x34d   :  { %661 = vpow2.f32 %v569_v20  ;;  %vm618_vm14 = vmor %vm616_vm6, %vm617_vm10 }
 0x353   :  { %v662_v22 = vpop.eup %661 }
 0x354   :  { %v598_v25 = vsel %vm597_vm5, 2143289344, %v662_v22  ;;  %vm574_vm5 = vcmp.eq.f32.partialorder %v844_v61, 1065353216 }
 0x355   :  { %v600_v28 = vsel %vm592_vm12, %v599_v26, %v598_v25  ;;  %vm573_vm12 = vcmp.eq.f32.partialorder %v844_v61, 0 }
 0x356   :  { %v602_v31 = vxor.u32 2147483648, %v600_v28  ;;  %vm620_vm4 = vmor %vm593_vm0, %vm573_vm12 }
 0x358   :  { %v603_v33 = vsel %vm601_vm11, %v602_v31, %v600_v28  ;;  %vm909_vm11 = vcmask 1041409  }
 0x359   :  { %v610_v36 = vsel %vm572_vm2, %v609_v34, %v603_v33 }
 0x35a   :  { %v615_v37 = vsel %vm596_vm7, %v614_v27, %v610_v36 }
 0x35b   :  { %v619_v38 = vsel %vm618_vm14, 2143289344, %v615_v37 }
 0x35c   :  { %v621_v41 = vsel %vm620_vm4, 1065353216, %v619_v38 }
 0x35d   :  { %v622_v42 = vsel %vm574_vm5, %v836_v39, %v621_v41 }
 0x35e   :  { %v424_v40 = vsel %vm223_vm3, %v622_v42, 0.0  ;;  %vm498_vm3 = vcmask 254976  }
 0x35f   :  { %425 = vadd.xlane.f32.xlu1 %v424_v40 }
 0x3d2   :  { %v426_v43 = vpop.xlane.xlu1 %425 }
 0x3d3   :  { %v427_v44 = vadd.f32 1e-16, %v426_v43 }
 0x3d5   :  { %663 = vrcp.f32 %v427_v44  ;;  %v439_v49 = vand.u32 2147483648, %v427_v44  ;;  %v437_v48 = vand.u32 2147483647, %v427_v44  ;;  %vm433_vm15 = vweird.f32 %v427_v44 }
 0x3d7   :  { %v440_v29 = vor.u32 1.1754944e-38, %v439_v49  ;;  %vm438_vm9 = vcmp.eq.f32.partialorder %v437_v48, 8.507059e+37 }
 0x3db   :  { %v664_v45 = vpop.eup %663 }
 0x3dc   :  { %v429_v46 = vmul.f32 %v664_v45, %v427_v44  ;;  %vm434_vm2 = vweird.f32 %v664_v45 }
 0x3dd   :  { %vm435_vm8 = vmor %vm433_vm15, %vm434_vm2 }
 0x3de   :  { %v430_v47 = vsub.f32 1.0, %v429_v46 }
 0x3e0   :  { %v431_v50 = vmul.f32 %v664_v45, %v430_v47 }
 0x3e2   :  { %v432_v51 = vadd.f32 %v664_v45, %v431_v50 }
 0x3e4   :  { %v436_v52 = vsel %vm435_vm8, %v664_v45, %v432_v51 }
 0x3e5   :  { %v441_v39 = vsel %vm438_vm9, %v440_v29, %v436_v52 }
 0x3e6   :  { %v442_v53 = vmul.f32 %v622_v42, %v441_v39 }
 0x3e8   :  { %494 = vrot.lane.b32.xlu2 %v442_v53, %s673_s1  ;;  %v444_v54 = vrot.slane %v442_v53, 1  ;;  %522 = vmatmul.msk.f32.vlgmr.msrb.gmra.mxu1 %vm165_vm1, %v442_v53 }
 0x3ea   :  { %523 = vmatmul.msk.f32.vlgmr.msra.gmra.mxu2 %vm165_vm1, %v444_v54 }
 0x442   :  { %v495_v58 = vpop.permute.xlu2 %494 }
 0x465   :  { %v464_v57 = vpop.f32.mrf.mxu1 }
 0x46d   :  { %v486_v55 = vpop.f32.mrf.mxu2 }
 0x46e   :  { %v491_v56 = vrot.slane %v486_v55, 7 }
 0x470   :  { %v492_v59 = vsel %vm909_vm11, %v491_v56, %v464_v57 }
 0x471   :  { %v497_v60 = vsel %vm165_vm1, %v492_v59, %v495_v58 }
 0x472   :  { %499 = vst.msk [vmem:[%s905_s6] sm:$0x3] %vm498_vm3, %v497_v60 }

</bundles_post_ra>
